<compile_context>
chip_gen: v6e
topology: v6e:2x2x1
jax: 0.10.0
libtpu: 0.0.40
codegen_flags: <defaults>
</compile_context>

<pallas_src>
import functools
import math

import jax
import jax.numpy as jnp
import numpy as np
from jax.experimental import pallas as pl
from jax.experimental.pallas import tpu as pltpu


def _round_up(v, m):
    return ((v + m - 1) // m) * m


def _attention_kernel(x_ref, w_ref, bias_ref, out_ref, *, total_rows, block_rows, ragged):
    # x_ref:    (TB, T, D)  input tile (D unpadded; any lane padding is layout-only)
    # w_ref:    (T, D)      attention weights (resident across grid steps)
    # bias_ref: (T, 1)      attention bias, f32 (resident)
    # out_ref:  (TB, D)     weighted-sum output tile
    x = x_ref[...].astype(jnp.float32)

    if ragged:
        # Last tile is partial: zero rows past the true batch so garbage HBM
        # rows never flow through tanh (their output rows are dropped on
        # writeback anyway, but masking keeps everything finite).
        row = jax.lax.broadcasted_iota(jnp.int32, x.shape, 0)
        valid = (pl.program_id(0) * block_rows + row) < total_rows
        x = jnp.where(valid, x, 0.0)

    w = w_ref[...].astype(jnp.float32)                               # (T, D)

    # Compact per-(b, t) logits: exact-f32 VPU multiply + lane reduce over D.
    # No MXU pass (the old precision=HIGHEST ones-matmul was removed).
    logits = jnp.sum(x * w[None, :, :], axis=-1, keepdims=True)      # (TB, T, 1)
    logits = logits + bias_ref[...][None, :, :]                      # + (1, T, 1)

    # tanh on the compact logits only: TB*T transcendentals per tile, not TB*T*D.
    scores = jnp.tanh(logits)                                        # (TB, T, 1)

    # Weighted sum over timesteps: lane-broadcast multiply + sublane reduce
    # over T with f32 accumulation (do NOT turn this into 1-row MXU matvecs).
    out = jnp.sum(scores * x, axis=1)                                # (TB, D)
    out_ref[...] = out.astype(out_ref.dtype)


def attention_forward(x, atten_w, atten_bias, *, block_b=1024):
    """x: (B, T, D) (f32 or bf16); atten_w: (T, D, 1) or (T, D); atten_bias: (T,1,1)/(T,).

    Returns (B, D), matching the PyTorch module's forward (after .squeeze()).
    """
    B, T, D = x.shape
    w = atten_w.reshape(T, D)
    bias = atten_bias.reshape(T, 1).astype(jnp.float32)

    itemsize = jnp.dtype(x.dtype).itemsize
    # VMEM footprint is based on the (8, 128)-tiled layout of the *blocks*, so
    # account for lane/sublane padding of the trailing dims.
    t_p = _round_up(T, 8)
    d_p = _round_up(D, 128)

    def working_set_bytes(tb):
        x_blk = tb * t_p * d_p * itemsize          # x block
        o_blk = tb * d_p * itemsize                # out block
        resident = t_p * d_p * itemsize + t_p * 128 * 4
        return 2 * x_blk + 2 * o_blk + resident    # double-buffered in/out

    # Batch tile: multiple of 8 (sublane constraint on the (TB, D) out block),
    # capped by block_b and by a VMEM budget that fits v7x's 64 MiB with
    # headroom (trivially fine on v5e/v6e's 128 MiB).
    vmem_budget = 40 * 1024 * 1024
    per_row = 2 * t_p * d_p * itemsize + 2 * d_p * itemsize
    tb = min(block_b, max(8, (vmem_budget // per_row) // 8 * 8))
    # Keep >= ~4 grid steps for large B so dimension_semantics=("parallel",)
    # can actually shard across v7x's two TensorCores and prefetch/writeback
    # overlap survives; never exceed the (rounded-up) batch itself.
    tb = min(tb, max(128, _round_up(pl.cdiv(B, 4), 8)))
    tb = max(8, min(tb, _round_up(B, 8)))
    tb = (tb // 8) * 8

    grid_b = pl.cdiv(B, tb)
    ragged = (B % tb) != 0

    kernel = functools.partial(
        _attention_kernel, total_rows=B, block_rows=tb, ragged=ragged
    )

    vmem_limit = int(min(48 * 1024 * 1024,
                         max(32 * 1024 * 1024, working_set_bytes(tb) * 5 // 4)))

    out = pl.pallas_call(
        kernel,
        out_shape=jax.ShapeDtypeStruct((B, D), x.dtype),
        grid=(grid_b,),
        in_specs=[
            # x: batch-tiled, pipelined; last two block dims equal the full
            # array dims (T, D) -> no HBM pre-pad, minimal DMA bytes.
            pl.BlockSpec((tb, T, D), lambda i: (i, 0, 0)),
            pl.BlockSpec((T, D), lambda i: (0, 0)),   # weights stay resident
            pl.BlockSpec((T, 1), lambda i: (0, 0)),   # bias stays resident
        ],
        out_specs=pl.BlockSpec((tb, D), lambda i: (i, 0)),
        compiler_params=pltpu.CompilerParams(
            dimension_semantics=("parallel",),        # megacore-shard batch on v7x
            vmem_limit_bytes=vmem_limit,
        ),
    )(x, w, bias)
    return out


def init_params(key, input_size, max_seq_len, dtype=jnp.float32):
    # Matches the PyTorch module: atten_w (T, D, 1) glorot-uniform with
    # stdv = sqrt(6 / (size(-2) + size(-1))) = sqrt(6 / (input_size + 1)),
    # atten_bias (T, 1, 1) zeros.
    stdv = math.sqrt(6.0 / (input_size + 1))
    atten_w = jax.random.uniform(
        key, (max_seq_len, input_size, 1), dtype=dtype, minval=-stdv, maxval=stdv
    )
    atten_bias = jnp.zeros((max_seq_len, 1, 1), dtype=dtype)
    return atten_w, atten_bias


def attention_ref(x, atten_w, atten_bias):
    # Exact float64 numpy reference of the PyTorch forward.
    x64 = np.asarray(x, dtype=np.float64)
    B, T, D = x64.shape
    w64 = np.asarray(atten_w, dtype=np.float64).reshape(T, D)
    b64 = np.asarray(atten_bias, dtype=np.float64).reshape(T)
    logits = (x64 * w64[None, :, :]).sum(axis=-1) + b64[None, :]   # (B, T)
    scores = np.tanh(logits)
    return (scores[:, :, None] * x64).sum(axis=1)                  # (B, D)


if __name__ == "__main__":
    B, T, D = 20, 8, 32  # batch, max_seq_len, input_size (small, non-multiple batch)
    key = jax.random.PRNGKey(0)
    kx, kw, kb = jax.random.split(key, 3)

    x = jax.random.normal(kx, (B, T, D), dtype=jnp.float32)
    atten_w, atten_bias = init_params(kw, input_size=D, max_seq_len=T)
    # Use a non-zero bias in the test so the bias-add path is actually checked.
    atten_bias = 0.1 * jax.random.normal(kb, atten_bias.shape, dtype=jnp.float32)

    ref = attention_ref(x, atten_w, atten_bias)

    # Default tile: single (partial) batch block -> exercises ragged masking.
    out = jax.block_until_ready(attention_forward(x, atten_w, atten_bias))
    assert out.shape == (B, D)
    np.testing.assert_allclose(np.asarray(out), ref, atol=1e-3, rtol=1e-3)

    # Small tile: exercises the multi-step batch grid + ragged tail masking.
    out_tiled = jax.block_until_ready(
        attention_forward(x, atten_w, atten_bias, block_b=8)
    )
    np.testing.assert_allclose(np.asarray(out_tiled), ref, atol=1e-3, rtol=1e-3)

    print("KERNEL_OK")
</pallas_src>

<mosaic_0001>
module attributes {stable_mosaic.version = 11 : i64} {
  func.func @_attention_kernel(%arg0: i32, %arg1: memref<24x8x32xf32, #tpu.memory_space<vmem>>, %arg2: memref<8x32xf32, #tpu.memory_space<vmem>>, %arg3: memref<8x1xf32, #tpu.memory_space<vmem>>, %arg4: memref<24x32xf32, #tpu.memory_space<vmem>>) attributes {dimension_semantics = [#tpu.dimension_semantics<parallel>], iteration_bounds = array<i64: 1>, scalar_prefetch = 0 : i64, scratch_operands = 0 : i64, tpu.core_type = #tpu.core_type<tc>, window_params = [{transform_indices = @transform_0, window_bounds = array<i64: 24, 8, 32>}, {pipeline_mode = #tpu.pipeline_mode<synchronous>, transform_indices = @transform_1, window_bounds = array<i64: 8, 32>}, {pipeline_mode = #tpu.pipeline_mode<synchronous>, transform_indices = @transform_2, window_bounds = array<i64: 8, 1>}, {transform_indices = @transform_3, window_bounds = array<i64: 24, 32>}]} {
    %c0 = arith.constant 0 : index
    %c0_0 = arith.constant 0 : index
    %c0_1 = arith.constant 0 : index
    %0 = vector.load %arg1[%c0, %c0_0, %c0_1] : memref<24x8x32xf32, #tpu.memory_space<vmem>>, vector<24x8x32xf32>
    %1 = tpu.iota {dimensions = array<i32: 0>} : vector<24x8x32xi32>
    %c24_i32 = arith.constant 24 : i32
    %2 = arith.muli %arg0, %c24_i32 : i32
    %3 = vector.broadcast %2 : i32 to vector<24x8x32xi32>
    %4 = arith.addi %3, %1 : vector<24x8x32xi32>
    %c20_i32 = arith.constant 20 : i32
    %5 = vector.broadcast %c20_i32 : i32 to vector<24x8x32xi32>
    %6 = arith.cmpi slt, %4, %5 : vector<24x8x32xi32>
    %cst = arith.constant 0.000000e+00 : f32
    %7 = vector.broadcast %cst : f32 to vector<24x8x32xf32>
    %8 = arith.select %6, %0, %7 : vector<24x8x32xi1>, vector<24x8x32xf32>
    %c0_2 = arith.constant 0 : index
    %c0_3 = arith.constant 0 : index
    %9 = vector.load %arg2[%c0_2, %c0_3] : memref<8x32xf32, #tpu.memory_space<vmem>>, vector<8x32xf32>
    %10 = vector.shape_cast %9 : vector<8x32xf32> to vector<1x8x32xf32>
    %11 = vector.broadcast %10 : vector<1x8x32xf32> to vector<24x8x32xf32>
    %12 = arith.mulf %8, %11 : vector<24x8x32xf32>
    %cst_4 = arith.constant dense<0.000000e+00> : vector<24x8xf32>
    %13 = vector.multi_reduction <add>, %12, %cst_4 [2] : vector<24x8x32xf32> to vector<24x8xf32>
    %14 = vector.shape_cast %13 : vector<24x8xf32> to vector<24x8x1xf32>
    %c0_5 = arith.constant 0 : index
    %c0_6 = arith.constant 0 : index
    %15 = vector.load %arg3[%c0_5, %c0_6] : memref<8x1xf32, #tpu.memory_space<vmem>>, vector<8x1xf32>
    %16 = vector.shape_cast %15 : vector<8x1xf32> to vector<1x8x1xf32>
    %17 = vector.broadcast %16 : vector<1x8x1xf32> to vector<24x8x1xf32>
    %18 = arith.addf %14, %17 : vector<24x8x1xf32>
    %19 = math.tanh %18 : vector<24x8x1xf32>
    %20 = vector.broadcast %19 : vector<24x8x1xf32> to vector<24x8x32xf32>
    %21 = arith.mulf %20, %8 : vector<24x8x32xf32>
    %cst_7 = arith.constant dense<0.000000e+00> : vector<24x32xf32>
    %22 = vector.multi_reduction <add>, %21, %cst_7 [1] : vector<24x8x32xf32> to vector<24x32xf32>
    %c0_8 = arith.constant 0 : index
    %c0_9 = arith.constant 0 : index
    %23 = vector.load %arg4[%c0_8, %c0_9] : memref<24x32xf32, #tpu.memory_space<vmem>>, vector<24x32xf32>
    tpu.vector_store %arg4[%c0_8, %c0_9], %22 {strides = array<i32>} : memref<24x32xf32, #tpu.memory_space<vmem>>, vector<24x32xf32>,
    return
  }
  func.func @transform_0(%arg0: i32) -> (i32, i32, i32) {
    %c0_i32 = arith.constant 0 : i32
    %c0_i32_0 = arith.constant 0 : i32
    %c0_i32_1 = arith.constant 0 : i32
    return %arg0, %c0_i32, %c0_i32_0 : i32, i32, i32
  }
  func.func @transform_1(%arg0: i32) -> (i32, i32) {
    %c0_i32 = arith.constant 0 : i32
    %c0_i32_0 = arith.constant 0 : i32
    %c0_i32_1 = arith.constant 0 : i32
    return %c0_i32, %c0_i32_0 : i32, i32
  }
  func.func @transform_2(%arg0: i32) -> (i32, i32) {
    %c0_i32 = arith.constant 0 : i32
    %c0_i32_0 = arith.constant 0 : i32
    %c0_i32_1 = arith.constant 0 : i32
    return %c0_i32, %c0_i32_0 : i32, i32
  }
  func.func @transform_3(%arg0: i32) -> (i32, i32) {
    %c0_i32 = arith.constant 0 : i32
    %c0_i32_0 = arith.constant 0 : i32
    return %arg0, %c0_i32 : i32, i32
  }
}

</mosaic_0001>

<bundles_post_ra>
// kernel: tpu_custom_call.1
= control target key start
LH: loop header
LB: loop body
LE: loop exit
PB: predicated region body
PF: predicated region fallthrough
CT: control target
= control target key end

     0   :  { %8 = vsyncpa [#allocation3], 0  ;;  %s1015_s0 = inlined_call_operand.hbm [shape: f32[20,8,32], index: 0, kind: input, shape index: {}]   ;;  %s1016_s1 = inlined_call_operand.vmem [shape: f32[8,32], index: 1, kind: input, shape index: {}]   ;;  %s1017_s2 = inlined_call_operand.vmem [shape: f32[8,1], index: 2, kind: input, shape index: {}]   ;;  %s1018_s3 = inlined_call_operand.hbm [shape: f32[20,32], index: 3, kind: output, shape index: {}]  }
   0x1   :  { %9 = vsyncpa [#allocation4], 0 }
   0x2   :  { %14 = vsyncadd [#allocation3], 512  ;;  %s759_s12 = smov [#allocation2]  }
   0x3   :  { %s15_s13 = sshll.u32 %s759_s12, 4  ;;  %s16_s13 = int_to_ptr.vmem [resolvable:$true] %s15_s13 }
   0x4   :  { %s723_s14 = scalar_lea.vmem %s16_s13, 2560  ;;  %s727_s15 = scalar_lea.vmem %s16_s13, 3072 }
   0x5   :  { %p724_p0 = scmp.ne.s32.totalorder %s16_s13, %s723_s14  ;;  %p728_p1 = scmp.lt.s32.totalorder %s16_s13, %s16_s13 }
   0x6   :  { %p729_p2 = scmp.lt.s32.totalorder %s727_s15, %s723_s14 }
   0x8   :  { %p730_p3 = por %p729_p2, %p728_p1 }
   0xa   :  { %p731_p4 = pnand %p730_p3, %p724_p0 }
   0xc   :  { %734 = shalt.err (!%p731_p4)
}
   0xd   :  { %s760_s16 = smov 128   ;;  %s761_s17 = smov 8  }
   0xe   :  { %21 = dma.hbm_to_vmem [thread:$0]  %s1015_s0, 2560, %s16_s13, [#allocation3], %s760_s16, %s760_s16, %s761_s17  }
   0xf   :  { %755 = dma.done.wait [#allocation3], 3072  }
  0x10   :  { %756 = vsyncadd [#allocation3], 4294964224  ;;  %v790_v0 = vld [vmem:[#allocation2 + $0x40] sm:$0xff]  ;;  %vm151_vm0 = vcmask 261120   ;;  %v803_v5 = vld [vmem:[#allocation2 + $0x48] sm:$0xff]  ;;  %v762_v51 = vmov 0  }
  0x11   :  { %v795_v1 = vld [vmem:[%s1016_s1] sm:$0xff]  ;;  %v805_v6 = vld [vmem:[#allocation2 + $0x8] sm:$0xff]  ;;  %v823_v17 = vld [vmem:[#allocation2 + $0x50] sm:$0xff]  ;;  %665 = vset.pattern.permute.xlu0 %v762_v51  ;;  %666 = vset.pattern.permute.xlu1 %v762_v51  ;;  %vm609_vm1 = vcmask 1041409   ;;  %vm611_vm2 = vcmask 1042434   ;;  %vm613_vm3 = vcmask 1043459  }
  0x12   :  { %v797_v2 = vld [vmem:[#allocation2] sm:$0xff]  ;;  %v135_v3 = vmul.f32 %v795_v1, %v790_v0  ;;  %v136_v7 = vmul.f32 %v795_v1, %v803_v5  ;;  %v128_v8 = vmul.f32 %v795_v1, %v805_v6  ;;  %v811_v9 = vld [vmem:[#allocation2 + $0x88] sm:$0xff]  ;;  %v825_v18 = vld [vmem:[#allocation2 + $0x10] sm:$0xff]  ;;  %v137_v21 = vmul.f32 %v795_v1, %v823_v17 }
  0x13   :  { %v127_v4 = vmul.f32 %v795_v1, %v797_v2  ;;  %v813_v10 = vld [vmem:[#allocation2 + $0x80] sm:$0xff]  ;;  %v144_v15 = vmul.f32 %v795_v1, %v811_v9  ;;  %v129_v22 = vmul.f32 %v795_v1, %v825_v18  ;;  %v833_v23 = vld [vmem:[#allocation2 + $0x18] sm:$0xff]  ;;  %v835_v24 = vld [vmem:[#allocation2 + $0x90] sm:$0xff]  ;;  %v147_v46 = vmul.f32 0.0, %v795_v1 }
  0x14   :  { %v176_v11 = vsel %vm151_vm0, %v135_v3, 0.0  ;;  %v179_v13 = vsel %vm151_vm0, %v136_v7, 0.0  ;;  %v155_v14 = vsel %vm151_vm0, %v128_v8, 0.0  ;;  %v143_v16 = vmul.f32 %v795_v1, %v813_v10  ;;  %v843_v29 = vld [vmem:[#allocation2 + $0x98] sm:$0xff]  ;;  %v853_v35 = vld [vmem:[#allocation2 + $0x60] sm:$0xff]  ;;  %v863_v41 = vld [vmem:[#allocation2 + $0x28] sm:$0xff] }
  0x15   :  { %v152_v12 = vsel %vm151_vm0, %v127_v4, 0.0  ;;  %177 = vadd.xlane.f32.xlu1 %v176_v11  ;;  %v203_v19 = vsel %vm151_vm0, %v144_v15, 0.0  ;;  %v182_v25 = vsel %vm151_vm0, %v137_v21, 0.0  ;;  %v158_v26 = vsel %vm151_vm0, %v129_v22, 0.0  ;;  %v845_v30 = vld [vmem:[#allocation2 + $0x58] sm:$0xff]  ;;  %v855_v36 = vld [vmem:[#allocation2 + $0x20] sm:$0xff] }
  0x16   :  { %153 = vadd.xlane.f32.xlu0 %v152_v12  ;;  %v200_v20 = vsel %vm151_vm0, %v143_v16, 0.0  ;;  %v130_v27 = vmul.f32 %v795_v1, %v833_v23  ;;  %v145_v28 = vmul.f32 %v795_v1, %v835_v24  ;;  %v146_v32 = vmul.f32 %v795_v1, %v843_v29  ;;  %v869_v45 = vld [vmem:[#allocation2 + $0x68] sm:$0xff]  ;;  %v875_v49 = vld [vmem:[#allocation2 + $0x70] sm:$0xff]  ;;  %v885_v56 = vld [vmem:[#allocation2 + $0x38] sm:$0xff] }
  0x17   :  { %v138_v34 = vmul.f32 %v795_v1, %v845_v30  ;;  %v139_v38 = vmul.f32 %v795_v1, %v853_v35  ;;  %v131_v40 = vmul.f32 %v795_v1, %v855_v36  ;;  %v132_v43 = vmul.f32 %v795_v1, %v863_v41  ;;  %v877_v50 = vld [vmem:[#allocation2 + $0x30] sm:$0xff]  ;;  %v891_v60 = vld [vmem:[#allocation2 + $0x78] sm:$0xff]  ;;  %v900_v3 = vld [vmem:[%s1017_s2] sm:$0xff]  ;;  %s763_s2 = smov [#allocation5]  }
  0x18   :  { %v161_v31 = vsel %vm151_vm0, %v130_v27, 0.0  ;;  %v206_v33 = vsel %vm151_vm0, %v145_v28, 0.0  ;;  %v209_v37 = vsel %vm151_vm0, %v146_v32, 0.0  ;;  %v140_v48 = vmul.f32 %v795_v1, %v869_v45  ;;  %s648_s22 = sshll.u32 %s763_s2, 4  ;;  %s649_s22 = int_to_ptr.vmem [resolvable:$true] %s648_s22 }
  0x19   :  { %180 = vadd.xlane.f32.xlu1 %v179_v13  ;;  %v185_v39 = vsel %vm151_vm0, %v138_v34, 0.0  ;;  %v188_v42 = vsel %vm151_vm0, %v139_v38, 0.0  ;;  %v164_v44 = vsel %vm151_vm0, %v131_v40, 0.0  ;;  %v167_v47 = vsel %vm151_vm0, %v132_v43, 0.0  ;;  %s735_s23 = scalar_lea.vmem %s649_s22, 384  ;;  %p740_p6 = scmp.lt.s32.totalorder %s649_s22, %s649_s22 }
  0x1a   :  { %156 = vadd.xlane.f32.xlu0 %v155_v14  ;;  %v212_v52 = vsel %vm151_vm0, %v147_v46, 0.0  ;;  %v141_v53 = vmul.f32 %v795_v1, %v875_v49  ;;  %v191_v54 = vsel %vm151_vm0, %v140_v48, 0.0  ;;  %v133_v55 = vmul.f32 %v795_v1, %v877_v50  ;;  %p736_p5 = scmp.ne.s32.totalorder %s649_s22, %s735_s23  ;;  %p741_p7 = scmp.lt.s32.totalorder %s735_s23, %s735_s23 }
  0x1b   :  { %v134_v58 = vmul.f32 %v795_v1, %v885_v56  ;;  %v142_v62 = vmul.f32 %v795_v1, %v891_v60  ;;  %vm615_vm4 = vcmask 1044484   ;;  %vm617_vm5 = vcmask 1045509  }
  0x1c   :  { %v194_v57 = vsel %vm151_vm0, %v141_v53, 0.0  ;;  %v170_v59 = vsel %vm151_vm0, %v133_v55, 0.0  ;;  %vm621_vm6 = vcmask 1047559   ;;  %vm619_vm7 = vcmask 1046534   ;;  %p742_p8 = por %p741_p7, %p740_p6 }
  0x1d   :  { %204 = vadd.xlane.f32.xlu1 %v203_v19  ;;  %v173_v61 = vsel %vm151_vm0, %v134_v58, 0.0  ;;  %v197_v63 = vsel %vm151_vm0, %v142_v62, 0.0 }
  0x1e   :  { %201 = vadd.xlane.f32.xlu0 %v200_v20  ;;  %p743_p9 = pnand %p742_p8, %p736_p5 }
  0x21   :  { %183 = vadd.xlane.f32.xlu1 %v182_v25 }
  0x22   :  { %159 = vadd.xlane.f32.xlu0 %v158_v26 }
  0x25   :  { %162 = vadd.xlane.f32.xlu1 %v161_v31 }
  0x26   :  { %207 = vadd.xlane.f32.xlu0 %v206_v33 }
  0x29   :  { %210 = vadd.xlane.f32.xlu1 %v209_v37 }
  0x2a   :  { %186 = vadd.xlane.f32.xlu0 %v185_v39 }
  0x2d   :  { %189 = vadd.xlane.f32.xlu1 %v188_v42 }
  0x2e   :  { %165 = vadd.xlane.f32.xlu0 %v164_v44 }
  0x31   :  { %168 = vadd.xlane.f32.xlu1 %v167_v47 }
  0x32   :  { %213 = vadd.xlane.f32.xlu0 %v212_v52 }
  0x35   :  { %216 = vadd.xlane.f32.xlu1 %v212_v52 }
  0x36   :  { %192 = vadd.xlane.f32.xlu0 %v191_v54 }
  0x39   :  { %195 = vadd.xlane.f32.xlu1 %v194_v57 }
  0x3a   :  { %171 = vadd.xlane.f32.xlu0 %v170_v59 }
  0x3d   :  { %174 = vadd.xlane.f32.xlu1 %v173_v61 }
  0x3e   :  { %219 = vadd.xlane.f32.xlu0 %v212_v52 }
  0x41   :  { %222 = vadd.xlane.f32.xlu1 %v212_v52 }
  0x42   :  { %198 = vadd.xlane.f32.xlu0 %v197_v63 }
  0x9e   :  { %v178_v4 = vpop.xlane.xlu1 %177 }
  0x9f   :  { %v154_v7 = vpop.xlane.xlu0 %153  ;;  %v233_v20 = vadd.f32 %v900_v3, %v178_v4 }
  0xa0   :  { %v225_v8 = vadd.f32 %v900_v3, %v154_v7 }
  0xa2   :  { %667 = vtanh.f32 %v225_v8  ;;  %v181_v11 = vpop.xlane.xlu1 %180 }
  0xa3   :  { %v157_v12 = vpop.xlane.xlu0 %156  ;;  %v234_v27 = vadd.f32 %v900_v3, %v181_v11 }
  0xa4   :  { %v226_v1 = vadd.f32 %v900_v3, %v157_v12 }
  0xa6   :  { %669 = vtanh.f32 %v226_v1  ;;  %v205_v13 = vpop.xlane.xlu1 %204 }
  0xa7   :  { %v202_v14 = vpop.xlane.xlu0 %201  ;;  %v242_v39 = vadd.f32 %v900_v3, %v205_v13 }
  0xa8   :  { %v241_v34 = vadd.f32 %v900_v3, %v202_v14 }
  0xaa   :  { %v184_v15 = vpop.xlane.xlu1 %183 }
  0xab   :  { %v160_v16 = vpop.xlane.xlu0 %159  ;;  %v235_v46 = vadd.f32 %v900_v3, %v184_v15 }
  0xac   :  { %v227_v19 = vadd.f32 %v900_v3, %v160_v16 }
  0xae   :  { %671 = vtanh.f32 %v227_v19  ;;  %v163_v21 = vpop.xlane.xlu1 %162 }
  0xaf   :  { %v668_v22 = vpop.eup %667  ;;  %v228_v25 = vadd.f32 %v900_v3, %v163_v21  ;;  %v208_v26 = vpop.xlane.xlu0 %207  ;;  %673 = vtanh.f32 %v233_v20 }
  0xb0   :  { %275 = vperm.xlu0 %665, %v668_v22   ;;  %v243_v53 = vadd.f32 %v900_v3, %v208_v26 }
  0xb1   :  { %675 = vtanh.f32 %v228_v25 }
  0xb2   :  { %v211_v28 = vpop.xlane.xlu1 %210  ;;  %677 = vtanh.f32 %v234_v27 }
  0xb3   :  { %v670_v31 = vpop.eup %669  ;;  %v244_v32 = vadd.f32 %v900_v3, %v211_v28  ;;  %v187_v33 = vpop.xlane.xlu0 %186 }
  0xb4   :  { %280 = vperm.xlu1 %666, %v670_v31   ;;  %v236_v61 = vadd.f32 %v900_v3, %v187_v33 }
  0xb5   :  { %679 = vtanh.f32 %v244_v32 }
  0xb6   :  { %v190_v37 = vpop.xlane.xlu1 %189 }
  0xb7   :  { %v237_v38 = vadd.f32 %v900_v3, %v190_v37  ;;  %v166_v44 = vpop.xlane.xlu0 %165 }
  0xb8   :  { %v229_v11 = vadd.f32 %v900_v3, %v166_v44 }
  0xb9   :  { %681 = vtanh.f32 %v237_v38 }
  0xba   :  { %683 = vtanh.f32 %v241_v34  ;;  %v169_v40 = vpop.xlane.xlu1 %168 }
  0xbb   :  { %v672_v42 = vpop.eup %671  ;;  %v230_v43 = vadd.f32 %v900_v3, %v169_v40  ;;  %685 = vtanh.f32 %v242_v39  ;;  %v214_v55 = vpop.xlane.xlu0 %213 }
  0xbc   :  { %285 = vperm.xlu1 %666, %v672_v42   ;;  %v674_v47 = vpop.eup %673  ;;  %v245_v15 = vadd.f32 %v900_v3, %v214_v55 }
  0xbd   :  { %687 = vtanh.f32 %v230_v43 }
  0xbe   :  { %v676_v48 = vpop.eup %675  ;;  %v217_v51 = vpop.xlane.xlu1 %216  ;;  %689 = vtanh.f32 %v235_v46 }
  0xbf   :  { %v246_v52 = vadd.f32 %v900_v3, %v217_v51  ;;  %290 = vperm.xlu0 %665, %v676_v48   ;;  %v678_v54 = vpop.eup %677  ;;  %v193_v8 = vpop.xlane.xlu0 %192 }
  0xc0   :  { %315 = vperm.xlu1 %666, %v674_v47   ;;  %v238_v21 = vadd.f32 %v900_v3, %v193_v8 }
  0xc1   :  { %691 = vtanh.f32 %v246_v52 }
  0xc2   :  { %v680_v57 = vpop.eup %679  ;;  %v196_v58 = vpop.xlane.xlu1 %195  ;;  %693 = vtanh.f32 %v243_v53 }
  0xc3   :  { %v239_v59 = vadd.f32 %v900_v3, %v196_v58  ;;  %370 = vperm.xlu0 %665, %v680_v57   ;;  %v172_v19 = vpop.xlane.xlu0 %171 }
  0xc4   :  { %320 = vperm.xlu1 %666, %v678_v54   ;;  %v231_v27 = vadd.f32 %v900_v3, %v172_v19 }
  0xc5   :  { %695 = vtanh.f32 %v239_v59 }
  0xc6   :  { %v682_v62 = vpop.eup %681  ;;  %v175_v63 = vpop.xlane.xlu1 %174  ;;  %697 = vtanh.f32 %v236_v61 }
  0xc7   :  { %v684_v4 = vpop.eup %683  ;;  %v232_v7 = vadd.f32 %v900_v3, %v175_v63  ;;  %335 = vperm.xlu0 %665, %v682_v62   ;;  %v220_v26 = vpop.xlane.xlu0 %219 }
  0xc8   :  { %355 = vperm.xlu1 %666, %v684_v4   ;;  %v686_v12 = vpop.eup %685  ;;  %v247_v32 = vadd.f32 %v900_v3, %v220_v26 }
  0xc9   :  { %699 = vtanh.f32 %v232_v7 }
  0xca   :  { %v688_v1 = vpop.eup %687  ;;  %v223_v13 = vpop.xlane.xlu1 %222  ;;  %701 = vtanh.f32 %v229_v11 }
  0xcb   :  { %v248_v14 = vadd.f32 %v900_v3, %v223_v13  ;;  %300 = vperm.xlu0 %665, %v688_v1   ;;  %v690_v16 = vpop.eup %689  ;;  %v199_v34 = vpop.xlane.xlu0 %198 }
  0xcc   :  { %360 = vperm.xlu1 %666, %v686_v12   ;;  %v240_v38 = vadd.f32 %v900_v3, %v199_v34 }
  0xcd   :  { %703 = vtanh.f32 %v248_v14 }
  0xce   :  { %v692_v20 = vpop.eup %691  ;;  %705 = vtanh.f32 %v245_v15 }
  0xcf   :  { %380 = vperm.xlu0 %665, %v692_v20   ;;  %v694_v22 = vpop.eup %693  ;;  %707 = vtanh.f32 %v238_v21 }
  0xd0   :  { %325 = vperm.xlu1 %666, %v690_v16   ;;  %709 = vtanh.f32 %v231_v27 }
  0xd1   :  { %711 = vtanh.f32 %v247_v32 }
  0xd2   :  { %v696_v25 = vpop.eup %695  ;;  %713 = vtanh.f32 %v240_v38 }
  0xd3   :  { %345 = vperm.xlu0 %665, %v696_v25   ;;  %v698_v28 = vpop.eup %697 }
  0xd4   :  { %365 = vperm.xlu1 %666, %v694_v22  }
  0xd6   :  { %v700_v31 = vpop.eup %699 }
  0xd7   :  { %310 = vperm.xlu0 %665, %v700_v31   ;;  %v702_v33 = vpop.eup %701 }
  0xd8   :  { %330 = vperm.xlu1 %666, %v698_v28  }
  0xda   :  { %v704_v37 = vpop.eup %703 }
  0xdb   :  { %390 = vperm.xlu0 %665, %v704_v37   ;;  %v706_v39 = vpop.eup %705 }
  0xdc   :  { %295 = vperm.xlu1 %666, %v702_v33   ;;  %v708_v40 = vpop.eup %707 }
  0xdd   :  { %v710_v42 = vpop.eup %709 }
  0xde   :  { %v712_v43 = vpop.eup %711 }
  0xdf   :  { %v714_v44 = vpop.eup %713 }
  0xe0   :  { %375 = vperm.xlu1 %666, %v706_v39  }
  0xe4   :  { %340 = vperm.xlu1 %666, %v708_v40  }
  0xe8   :  { %305 = vperm.xlu1 %666, %v710_v42  }
  0xec   :  { %385 = vperm.xlu1 %666, %v712_v43  }
  0xf0   :  { %350 = vperm.xlu1 %666, %v714_v44  }
 0x12b   :  { %v276_v47 = vpop.permute.xlu0 %275 }
 0x12c   :  { %v393_v52 = vmul.f32 %v276_v47, %v797_v2 }
 0x12e   :  { %v417_v59 = vsel %vm151_vm0, %v393_v52, 0.0 }
 0x12f   :  { %v281_v46 = vpop.permute.xlu1 %280  ;;  %v418_v2 = vrot.slane %v417_v59, 4 }
 0x130   :  { %v394_v48 = vmul.f32 %v281_v46, %v805_v6 }
 0x131   :  { %v419_v15 = vadd.f32 %v418_v2, %v417_v59 }
 0x132   :  { %v424_v53 = vsel %vm151_vm0, %v394_v48, 0.0 }
 0x133   :  { %v425_v61 = vrot.slane %v424_v53, 4  ;;  %v420_v28 = vrot.slane %v419_v15, 2 }
 0x135   :  { %v426_v8 = vadd.f32 %v425_v61, %v424_v53  ;;  %v421_v43 = vadd.f32 %v420_v28, %v419_v15 }
 0x137   :  { %v286_v51 = vpop.permute.xlu1 %285  ;;  %v427_v20 = vrot.slane %v426_v8, 2 }
 0x138   :  { %v395_v3 = vmul.f32 %v286_v51, %v825_v18 }
 0x139   :  { %v428_v33 = vadd.f32 %v427_v20, %v426_v8 }
 0x13a   :  { %v291_v54 = vpop.permute.xlu0 %290  ;;  %v431_v55 = vsel %vm151_vm0, %v395_v3, 0.0 }
 0x13b   :  { %v316_v57 = vpop.permute.xlu1 %315  ;;  %v396_v58 = vmul.f32 %v291_v54, %v833_v23  ;;  %v432_v63 = vrot.slane %v431_v55, 4  ;;  %v429_v51 = vrot.slane %v428_v33, 1 }
 0x13c   :  { %v401_v62 = vmul.f32 %v316_v57, %v790_v0 }
 0x13d   :  { %v438_v6 = vsel %vm151_vm0, %v396_v58, 0.0  ;;  %v433_v23 = vadd.f32 %v432_v63, %v431_v55  ;;  %v422_v58 = vrot.slane %v421_v43, 1  ;;  %v430_v2 = vadd.f32 %v429_v51, %v428_v33 }
 0x13e   :  { %v371_v4 = vpop.permute.xlu0 %370  ;;  %v473_v11 = vsel %vm151_vm0, %v401_v62, 0.0  ;;  %v439_v1 = vrot.slane %v438_v6, 4 }
 0x13f   :  { %v321_v7 = vpop.permute.xlu1 %320  ;;  %v412_v18 = vmul.f32 %v371_v4, %v843_v29  ;;  %v474_v16 = vrot.slane %v473_v11, 4  ;;  %v434_v26 = vrot.slane %v433_v23, 2 }
 0x140   :  { %v402_v12 = vmul.f32 %v321_v7, %v803_v5  ;;  %v440_v22 = vadd.f32 %v439_v1, %v438_v6 }
 0x141   :  { %v550_v14 = vsel %vm151_vm0, %v412_v18, 0.0  ;;  %v475_v5 = vadd.f32 %v474_v16, %v473_v11  ;;  %v435_v42 = vadd.f32 %v434_v26, %v433_v23 }
 0x142   :  { %v480_v13 = vsel %vm151_vm0, %v402_v12, 0.0  ;;  %v336_v0 = vpop.permute.xlu0 %335  ;;  %v551_v25 = vrot.slane %v550_v14, 4  ;;  %v441_v37 = vrot.slane %v440_v22, 2 }
 0x143   :  { %v356_v19 = vpop.permute.xlu1 %355  ;;  %v405_v21 = vmul.f32 %v336_v0, %v853_v35  ;;  %v481_v29 = vrot.slane %v480_v13, 4  ;;  %v476_v44 = vrot.slane %v475_v5, 2  ;;  %v436_v55 = vrot.slane %v435_v42, 1 }
 0x144   :  { %v409_v31 = vmul.f32 %v356_v19, %v813_v10  ;;  %v552_v39 = vadd.f32 %v551_v25, %v550_v14  ;;  %v442_v52 = vadd.f32 %v441_v37, %v440_v22 }
 0x145   :  { %v501_v34 = vsel %vm151_vm0, %v405_v21, 0.0  ;;  %v482_v38 = vadd.f32 %v481_v29, %v480_v13  ;;  %v477_v59 = vadd.f32 %v476_v44, %v475_v5  ;;  %v437_v11 = vadd.f32 %v436_v55, %v435_v42 }
 0x146   :  { %v301_v27 = vpop.permute.xlu0 %300  ;;  %v529_v46 = vsel %vm151_vm0, %v409_v31, 0.0  ;;  %v502_v47 = vrot.slane %v501_v34, 4  ;;  %v553_v53 = vrot.slane %v552_v39, 2  ;;  %v443_v7 = vrot.slane %v442_v52, 1 }
 0x147   :  { %v361_v32 = vpop.permute.xlu1 %360  ;;  %v398_v10 = vmul.f32 %v301_v27, %v863_v41  ;;  %v483_v3 = vrot.slane %v482_v38, 2  ;;  %v530_v57 = vrot.slane %v529_v46, 4  ;;  %v423_v13 = vadd.f32 %v422_v58, %v421_v43 }
 0x148   :  { %v410_v40 = vmul.f32 %v361_v32, %v811_v9  ;;  %v503_v61 = vadd.f32 %v502_v47, %v501_v34  ;;  %v554_v8 = vadd.f32 %v553_v53, %v552_v39  ;;  %v478_v14 = vrot.slane %v477_v59, 1 }
 0x149   :  { %v452_v6 = vsel %vm151_vm0, %v398_v10, 0.0  ;;  %v484_v18 = vadd.f32 %v483_v3, %v482_v38  ;;  %v531_v12 = vadd.f32 %v530_v57, %v529_v46  ;;  %v610_v21 = vsel %vm609_vm1, %v430_v2, %v423_v13 }
 0x14a   :  { %v381_v35 = vpop.permute.xlu0 %380  ;;  %v536_v54 = vsel %vm151_vm0, %v410_v40, 0.0  ;;  %v504_v0 = vrot.slane %v503_v61, 2  ;;  %v453_v15 = vrot.slane %v452_v6, 4  ;;  %v444_v22 = vadd.f32 %v443_v7, %v442_v52 }
 0x14b   :  { %v326_v48 = vpop.permute.xlu1 %325  ;;  %v537_v63 = vrot.slane %v536_v54, 4  ;;  %v485_v29 = vrot.slane %v484_v18, 1  ;;  %v555_v25 = vrot.slane %v554_v8, 1  ;;  %v612_v26 = vsel %vm611_vm2, %v437_v11, %v610_v21 }
 0x14c   :  { %v403_v4 = vmul.f32 %v326_v48, %v823_v17  ;;  %v532_v27 = vrot.slane %v531_v12, 2  ;;  %v479_v31 = vadd.f32 %v478_v14, %v477_v59  ;;  %v454_v32 = vadd.f32 %v453_v15, %v452_v6 }
 0x14d   :  { %v538_v19 = vadd.f32 %v537_v63, %v536_v54  ;;  %v414_v34 = vmul.f32 0.0, %v381_v35  ;;  %v957_v39 = vadd.f32 %v504_v0, %v503_v61  ;;  %v961_v43 = vsel %vm613_vm3, %v444_v22, %v612_v26 }
 0x14e   :  { %v346_v9 = vpop.permute.xlu0 %345  ;;  %v487_v17 = vsel %vm151_vm0, %v403_v4, 0.0  ;;  %v486_v44 = vadd.f32 %v485_v29, %v484_v18  ;;  %v963_v46 = vadd.f32 %v555_v25, %v554_v8  ;;  %v455_v10 = vrot.slane %v454_v32, 2 }
 0x14f   :  { %v366_v62 = vpop.permute.xlu1 %365  ;;  %v488_v33 = vrot.slane %v487_v17, 4  ;;  %v564_v3 = vsel %vm151_vm0, %v414_v34, 0.0  ;;  %v407_v58 = vmul.f32 %v346_v9, %v875_v49 }
 0x150   :  { %v411_v41 = vmul.f32 %v366_v62, %v835_v24  ;;  %v971_v6 = vsel %vm609_vm1, %v486_v44, %v479_v31  ;;  %v456_v7 = vadd.f32 %v455_v10, %v454_v32 }
 0x151   :  { %v489_v52 = vadd.f32 %v488_v33, %v487_v17  ;;  %v515_v49 = vsel %vm151_vm0, %v407_v58, 0.0 }
 0x152   :  { %v543_v1 = vsel %vm151_vm0, %v411_v41, 0.0  ;;  %v311_v23 = vpop.permute.xlu0 %310  ;;  %v565_v41 = vrot.slane %v564_v3, 4  ;;  %v516_v22 = vrot.slane %v515_v49, 4 }
 0x153   :  { %v331_v16 = vpop.permute.xlu1 %330  ;;  %v544_v20 = vrot.slane %v543_v1, 4  ;;  %v400_v5 = vmul.f32 %v311_v23, %v885_v56  ;;  %v533_v56 = vadd.f32 %v532_v27, %v531_v12  ;;  %v490_v18 = vrot.slane %v489_v52, 2 }
 0x154   :  { %v404_v24 = vmul.f32 %v331_v16, %v845_v30  ;;  %v539_v30 = vrot.slane %v538_v19, 2 }
 0x155   :  { %v545_v40 = vadd.f32 %v544_v20, %v543_v1  ;;  %v466_v48 = vsel %vm151_vm0, %v400_v5, 0.0  ;;  %v534_v4 = vrot.slane %v533_v56, 1  ;;  %v491_v21 = vadd.f32 %v490_v18, %v489_v52 }
 0x156   :  { %v494_v28 = vsel %vm151_vm0, %v404_v24, 0.0  ;;  %v391_v38 = vpop.permute.xlu0 %390  ;;  %v540_v55 = vadd.f32 %v539_v30, %v538_v19  ;;  %v467_v61 = vrot.slane %v466_v48, 4  ;;  %v566_v19 = vadd.f32 %v565_v41, %v564_v3 }
 0x157   :  { %v296_v37 = vpop.permute.xlu1 %295  ;;  %v495_v47 = vrot.slane %v494_v28, 4  ;;  %v416_v51 = vmul.f32 0.0, %v391_v38  ;;  %v546_v57 = vrot.slane %v545_v40, 2  ;;  %v535_v16 = vadd.f32 %v534_v4, %v533_v56 }
 0x158   :  { %v397_v42 = vmul.f32 %v296_v37, %v855_v36  ;;  %v506_v36 = vrot.slane %v957_v39, 1  ;;  %v541_v1 = vrot.slane %v540_v55, 1  ;;  %v468_v14 = vadd.f32 %v467_v61, %v466_v48 }
 0x159   :  { %v496_v59 = vadd.f32 %v495_v47, %v494_v28  ;;  %v578_v2 = vsel %vm151_vm0, %v416_v51, 0.0  ;;  %v547_v23 = vadd.f32 %v546_v57, %v545_v40  ;;  %v457_v24 = vrot.slane %v456_v7, 1 }
 0x15a   :  { %v445_v35 = vsel %vm151_vm0, %v397_v42, 0.0  ;;  %v579_v0 = vrot.slane %v578_v2, 4  ;;  %v542_v31 = vadd.f32 %v541_v1, %v540_v55  ;;  %v469_v33 = vrot.slane %v468_v14, 2 }
 0x15b   :  { %v446_v53 = vrot.slane %v445_v35, 4  ;;  %v376_v54 = vpop.permute.xlu1 %375  ;;  %v497_v13 = vrot.slane %v496_v59, 2  ;;  %v548_v26 = vrot.slane %v547_v23, 1  ;;  %v458_v40 = vadd.f32 %v457_v24, %v456_v7 }
 0x15c   :  { %v413_v63 = vmul.f32 0.0, %v376_v54  ;;  %v492_v42 = vrot.slane %v491_v21, 1  ;;  %v567_v44 = vrot.slane %v566_v19, 2  ;;  %v630_v10 = vsel %vm609_vm1, %v542_v31, %v535_v16 }
 0x15d   :  { %v447_v62 = vadd.f32 %v446_v53, %v445_v35  ;;  %v498_v32 = vadd.f32 %v497_v13, %v496_v59  ;;  %v549_v48 = vadd.f32 %v548_v26, %v547_v23  ;;  %v517_v35 = vadd.f32 %v516_v22, %v515_v49 }
 0x15e   :  { %v557_v11 = vsel %vm151_vm0, %v413_v63, 0.0  ;;  %v470_v3 = vadd.f32 %v469_v33, %v468_v14  ;;  %v568_v59 = vadd.f32 %v567_v44, %v566_v19  ;;  %v493_v41 = vadd.f32 %v492_v42, %v491_v21 }
 0x15f   :  { %v448_v8 = vrot.slane %v447_v62, 2  ;;  %v341_v12 = vpop.permute.xlu1 %340  ;;  %v558_v9 = vrot.slane %v557_v11, 4  ;;  %v499_v52 = vrot.slane %v498_v32, 1  ;;  %v518_v7 = vrot.slane %v517_v35, 2 }
 0x160   :  { %v406_v15 = vmul.f32 %v341_v12, %v869_v45  ;;  %v580_v45 = vadd.f32 %v579_v0, %v578_v2  ;;  %v631_v2 = vsel %vm611_vm2, %v549_v48, %v630_v10  ;;  %v624_v19 = vsel %vm611_vm2, %v493_v41, %v971_v6 }
 0x161   :  { %v449_v17 = vadd.f32 %v448_v8, %v447_v62  ;;  %v559_v20 = vadd.f32 %v558_v9, %v557_v11  ;;  %v500_v8 = vadd.f32 %v499_v52, %v498_v32  ;;  %v471_v11 = vrot.slane %v470_v3, 1 }
 0x162   :  { %v508_v29 = vsel %vm151_vm0, %v406_v15, 0.0  ;;  %v581_v55 = vrot.slane %v580_v45, 2 }
 0x163   :  { %v306_v25 = vpop.permute.xlu1 %305  ;;  %v560_v27 = vrot.slane %v559_v20, 2  ;;  %v509_v28 = vrot.slane %v508_v29, 4  ;;  %v450_v34 = vrot.slane %v449_v17, 1  ;;  %v472_v24 = vadd.f32 %v471_v11, %v470_v3 }
 0x164   :  { %v399_v5 = vmul.f32 %v306_v25, %v877_v50  ;;  %v582_v49 = vadd.f32 %v581_v55, %v580_v45 }
 0x165   :  { %v561_v37 = vadd.f32 %v560_v27, %v559_v20  ;;  %v510_v38 = vadd.f32 %v509_v28, %v508_v29  ;;  %v451_v54 = vadd.f32 %v450_v34, %v449_v17  ;;  %v569_v17 = vrot.slane %v568_v59, 1 }
 0x166   :  { %v459_v30 = vsel %vm151_vm0, %v399_v5, 0.0  ;;  %v632_v20 = vsel %vm613_vm3, %v963_v46, %v631_v2  ;;  %v625_v29 = vsel %vm613_vm3, %v500_v8, %v624_v19  ;;  %v583_v25 = vrot.slane %v582_v49, 1 }
 0x167   :  { %v460_v47 = vrot.slane %v459_v30, 4  ;;  %v386_v56 = vpop.permute.xlu1 %385  ;;  %v511_v51 = vrot.slane %v510_v38, 2  ;;  %v562_v57 = vrot.slane %v561_v37, 1  ;;  %v616_v23 = vsel %vm615_vm4, %v451_v54, %v961_v43 }
 0x168   :  { %v415_v50 = vmul.f32 0.0, %v386_v56  ;;  %v618_v27 = vsel %vm617_vm5, %v458_v40, %v616_v23  ;;  %v507_v46 = vadd.f32 %v506_v36, %v957_v39  ;;  %v570_v32 = vadd.f32 %v569_v17, %v568_v59 }
 0x169   :  { %v461_v53 = vadd.f32 %v460_v47, %v459_v30  ;;  %v512_v61 = vadd.f32 %v511_v51, %v510_v38  ;;  %v563_v9 = vadd.f32 %v562_v57, %v561_v37  ;;  %v584_v38 = vadd.f32 %v583_v25, %v582_v49 }
 0x16a   :  { %v571_v58 = vsel %vm151_vm0, %v415_v50, 0.0  ;;  %v626_v30 = vsel %vm615_vm4, %v507_v46, %v625_v29 }
 0x16b   :  { %v462_v62 = vrot.slane %v461_v53, 2  ;;  %v572_v63 = vrot.slane %v571_v58, 4  ;;  %v351_v4 = vpop.permute.xlu1 %350  ;;  %v513_v14 = vrot.slane %v512_v61, 1  ;;  %v633_v26 = vsel %vm615_vm4, %v563_v9, %v632_v20 }
 0x16c   :  { %v408_v18 = vmul.f32 %v351_v4, %v891_v60  ;;  %v519_v60 = vadd.f32 %v518_v7, %v517_v35  ;;  %v634_v40 = vsel %vm617_vm5, %v570_v32, %v633_v26 }
 0x16d   :  { %v463_v12 = vadd.f32 %v462_v62, %v461_v53  ;;  %v573_v1 = vadd.f32 %v572_v63, %v571_v58  ;;  %v514_v28 = vadd.f32 %v513_v14, %v512_v61 }
 0x16e   :  { %v522_v13 = vsel %vm151_vm0, %v408_v18, 0.0  ;;  %v520_v33 = vrot.slane %v519_v60, 1 }
 0x16f   :  { %v464_v0 = vrot.slane %v463_v12, 1  ;;  %v574_v15 = vrot.slane %v573_v1, 2  ;;  %v523_v16 = vrot.slane %v522_v13, 4  ;;  %v627_v42 = vsel %vm617_vm5, %v514_v28, %v626_v30 }
 0x170   :  { %v521_v39 = vadd.f32 %v520_v33, %v519_v60 }
 0x171   :  { %v465_v21 = vadd.f32 %v464_v0, %v463_v12  ;;  %v575_v22 = vadd.f32 %v574_v15, %v573_v1  ;;  %v524_v43 = vadd.f32 %v523_v16, %v522_v13 }
 0x172   :  { %v628_v48 = vsel %vm619_vm7, %v521_v39, %v627_v42 }
 0x173   :  { %v576_v5 = vrot.slane %v575_v22, 1  ;;  %v525_v31 = vrot.slane %v524_v43, 2  ;;  %v620_v6 = vsel %vm619_vm7, %v465_v21, %v618_v27 }
 0x174   :  { %v622_v45 = vsel %vm621_vm6, %v472_v24, %v620_v6 }
 0x175   :  { %v577_v34 = vadd.f32 %v576_v5, %v575_v22  ;;  %v526_v37 = vadd.f32 %v525_v31, %v524_v43  ;;  %640 = vst.msk [vmem:[#allocation5] sm:$0xff] %vm151_vm0, %v622_v45 }
 0x177   :  { %v527_v44 = vrot.slane %v526_v37, 1  ;;  %v635_v47 = vsel %vm619_vm7, %v577_v34, %v634_v40 }
 0x178   :  { %v636_v36 = vsel %vm621_vm6, %v584_v38, %v635_v47 }
 0x179   :  { %v528_v56 = vadd.f32 %v527_v44, %v526_v37  ;;  %642 = vst.msk [vmem:[#allocation5 + $0x10] sm:$0xff] %vm151_vm0, %v636_v36 }
 0x17b   :  { %v629_v35 = vsel %vm621_vm6, %v528_v56, %v628_v48 }
 0x17c   :  { %641 = vst.msk [vmem:[#allocation5 + $0x8] sm:$0xff] %vm151_vm0, %v629_v35 }
 0x17d   :  { %746 = shalt.err (!%p743_p9)
}
 0x17e   :  { %654 = dma.vmem_to_hbm [thread:$0]  %s649_s22, 384, %s1018_s3, [#allocation4], %s760_s16, %s760_s16, %s761_s17  }
 0x17f   :  { %757 = dma.done.wait [#allocation4], 384  }
 0x180   :  { %758 = vsyncadd [#allocation4], 4294966912 }
 0x181   :  { %658 = vsyncpa [#allocation3], 1 }
 0x182   :  { %659 = vsyncpa [#allocation4], 1 }

</bundles_post_ra>
